<compile_context>
chip_gen: v7x
topology: tpu7x:2x2x1
jax: 0.10.0
libtpu: 0.0.40
codegen_flags: <defaults>
</compile_context>

<pallas_src>
import jax
import jax.numpy as jnp
from jax.experimental import pallas as pl
from jax.experimental.pallas import tpu as pltpu


def _round_up(x, m):
    return ((x + m - 1) // m) * m


def _vmem_physical_bytes():
    """Best-effort physical per-core VMEM size; conservative v7x fallback."""
    try:
        info = pltpu.get_tpu_info()
        for attr in ("vmem_capacity_bytes", "vmem_bytes", "vmem_size_bytes"):
            v = getattr(info, attr, None)
            if v:
                return int(v)
    except Exception:
        pass
    return 64 << 20   # v7x per-TensorCore VMEM (smallest of v5e/v6e/v7x)


def _make_net_kernel(want_logits, want_probs, approx_recip):
    """Fused:  logits = x @ W + b ;  probs = softmax(logits, axis=-1)."""

    def kernel(x_ref, w_ref, b_ref, *out_refs):
        # x: (B_TILE, F_PAD) f32, streamed; cast to bf16 in vregs (no wrapper
        # HBM round-trip).  w: (F_PAD, C_PAD) bf16 resident.  b: (1, C_PAD)
        # f32 whose padded lanes are -inf -> exp(-inf)=0, self-masking.
        x = x_ref[...].astype(jnp.bfloat16)
        logits = jnp.dot(x, w_ref[...],
                         preferred_element_type=jnp.float32) + b_ref[...]
        i = 0
        if want_logits:
            out_refs[i][...] = logits.astype(out_refs[i].dtype)
            i += 1
        if want_probs:
            m = jnp.max(logits, axis=-1, keepdims=True)
            e = jnp.exp(logits - m)                     # padded lanes -> 0
            denom = jnp.sum(e, axis=-1, keepdims=True)
            if approx_recip:
                # approx reciprocal runs on the otherwise-idle EUP slot.
                probs = e * pl.reciprocal(denom, approx=True)
            else:
                probs = e / denom
            out_refs[i][...] = probs.astype(out_refs[i].dtype)

    return kernel


class PallasNet:
    """Net.forward + eval softmax fused into one Pallas kernel.

    Weight/bias padding and the bf16 cast happen ONCE here (cached); only the
    activations move per forward call.
    """

    def __init__(self, w, b):
        F, C = w.shape
        self.F, self.C = F, C
        # bf16 W: sublane axis (F) must respect the bf16 (16,128) min tile.
        self.F_pad = _round_up(F, 16)
        # Lane-dense outputs: pad classes up to a multiple of 128.
        self.C_pad = _round_up(C, 128)
        self.w_p = (jnp.zeros((self.F_pad, self.C_pad), jnp.bfloat16)
                    .at[:F, :C].set(w.astype(jnp.bfloat16)))
        # Padded output classes get bias = -inf => zero softmax contribution,
        # so no in-kernel masking is needed.
        self.b_p = (jnp.full((1, self.C_pad), -jnp.inf, jnp.float32)
                    .at[0, :C].set(b.reshape(-1).astype(jnp.float32)))

    def __call__(self, x, *, want_logits=False, want_probs=True,
                 b_tile=512, out_dtype=jnp.bfloat16, approx_recip=True,
                 unpad=False):
        assert want_logits or want_probs
        B, F = x.shape
        assert F == self.F, "feature dim mismatch"

        out_dtype = jnp.dtype(out_dtype)
        # bf16 outputs need 16-sublane batch tiles; f32 needs 8.
        align = 16 if out_dtype.itemsize < 4 else 8

        B_pad = _round_up(B, align)
        B_TILE = min(_round_up(b_tile, align), B_pad)
        # v7x megacore: guarantee >=2 batch tiles whenever the batch can be
        # split, so dimension_semantics=("parallel",) feeds both TensorCores.
        if B_pad >= 2 * align and B_pad <= B_TILE:
            B_TILE = _round_up((B_pad + 1) // 2, align)
        B_pad = _round_up(B_pad, B_TILE)
        grid = (B_pad // B_TILE,)

        # x stays f32 and is streamed straight from HBM; zero-pad only when
        # shapes require it (no dtype cast in the wrapper).
        if (B_pad, self.F_pad) != (B, F):
            x = jnp.pad(x, ((0, B_pad - B), (0, self.F_pad - F)))

        n_out = int(want_logits) + int(want_probs)
        out_shape = tuple(jax.ShapeDtypeStruct((B_pad, self.C_pad), out_dtype)
                          for _ in range(n_out))
        out_specs = tuple(pl.BlockSpec((B_TILE, self.C_pad), lambda i: (i, 0))
                          for _ in range(n_out))

        # VMEM budget: streamed x / output tiles are double-buffered; W / b
        # are resident (same block every grid step).  Leave 25% headroom vs
        # the physical per-core VMEM (only 64 MiB on v7x).
        tile_bytes = (B_TILE * self.F_pad * 4
                      + n_out * B_TILE * self.C_pad * out_dtype.itemsize)
        resident_bytes = self.F_pad * self.C_pad * 2 + self.C_pad * 4
        vmem_cap = (_vmem_physical_bytes() * 3) // 4
        vmem_limit = int(min(max(2 * tile_bytes + 2 * resident_bytes + (4 << 20),
                                 16 << 20),
                             vmem_cap))
        if resident_bytes + 2 * tile_bytes > vmem_cap:
            # TODO(synk): add a C (class) grid axis + online softmax for
            # vocab-scale heads whose weights don't fit resident in VMEM.
            raise ValueError("weights + tiles exceed VMEM budget; reduce "
                             "b_tile or add C-tiling")

        outs = pl.pallas_call(
            _make_net_kernel(want_logits, want_probs, approx_recip),
            out_shape=out_shape,
            grid=grid,
            in_specs=[
                pl.BlockSpec((B_TILE, self.F_pad), lambda i: (i, 0)),      # x
                pl.BlockSpec((self.F_pad, self.C_pad), lambda i: (0, 0)),  # W
                pl.BlockSpec((1, self.C_pad), lambda i: (0, 0)),           # b
            ],
            out_specs=out_specs,
            compiler_params=pltpu.CompilerParams(
                dimension_semantics=("parallel",),   # batch tiles -> both TCs
                vmem_limit_bytes=vmem_limit,
            ),
        )(x, self.w_p, self.b_p)

        if unpad:
            outs = tuple(o[:B, :self.C] for o in outs)
        return outs if n_out > 1 else outs[0]


if __name__ == "__main__":
    # Small, deterministic shapes consistent with a classifier forward pass.
    B, F, C = 8, 32, 10   # batch, in_features, num_classes

    key = jax.random.PRNGKey(0)
    kx, kw, kb = jax.random.split(key, 3)
    x = jax.random.normal(kx, (B, F), dtype=jnp.float32)
    w = jax.random.normal(kw, (F, C), dtype=jnp.float32) * 0.1
    b = jax.random.normal(kb, (1, C), dtype=jnp.float32) * 0.01

    net = PallasNet(w, b)   # weights padded/cast once, reused across calls

    # Reference on the same bf16-cast operands (kernel uses bf16 MXU, f32 acc).
    xr = x.astype(jnp.bfloat16).astype(jnp.float32)
    wr = w.astype(jnp.bfloat16).astype(jnp.float32)
    ref_logits = xr @ wr + b
    ref_probs = jax.nn.softmax(ref_logits, axis=-1)

    # Eval path of Net: softmax(model(x)) -- probs only, bf16 writeback.
    probs_padded = net(x)                      # (B_pad, C_pad), padded lanes = 0
    jax.block_until_ready(probs_padded)
    probs = probs_padded[:B, :C].astype(jnp.float32)
    assert jnp.allclose(probs, ref_probs, atol=1.5e-2), "softmax mismatch"

    # Training-style path: raw logits + probs, f32 outputs, exact divide.
    logits, probs2 = net(x, want_logits=True, out_dtype=jnp.float32,
                         approx_recip=False, unpad=True)
    jax.block_until_ready((logits, probs2))
    assert jnp.allclose(logits, ref_logits, atol=1e-3, rtol=1e-3), "logits mismatch"
    assert jnp.allclose(probs2, ref_probs, atol=2e-3), "probs mismatch"

    print("KERNEL_OK")
</pallas_src>

<mosaic_0001>
module attributes {stable_mosaic.version = 11 : i64} {
  func.func @kernel(%arg0: i32, %arg1: memref<16x32xf32, #tpu.memory_space<vmem>>, %arg2: memref<32x128xbf16, #tpu.memory_space<vmem>>, %arg3: memref<1x128xf32, #tpu.memory_space<vmem>>, %arg4: memref<16x128xbf16, #tpu.memory_space<vmem>>) attributes {dimension_semantics = [#tpu.dimension_semantics<parallel>], iteration_bounds = array<i64: 1>, scalar_prefetch = 0 : i64, scratch_operands = 0 : i64, tpu.core_type = #tpu.core_type<tc>, window_params = [{transform_indices = @transform_0, window_bounds = array<i64: 16, 32>}, {pipeline_mode = #tpu.pipeline_mode<synchronous>, transform_indices = @transform_1, window_bounds = array<i64: 32, 128>}, {pipeline_mode = #tpu.pipeline_mode<synchronous>, transform_indices = @transform_2, window_bounds = array<i64: 1, 128>}, {transform_indices = @transform_3, window_bounds = array<i64: 16, 128>}]} {
    %c0 = arith.constant 0 : index
    %c0_0 = arith.constant 0 : index
    %0 = vector.load %arg1[%c0, %c0_0] : memref<16x32xf32, #tpu.memory_space<vmem>>, vector<16x32xf32>
    %1 = arith.truncf %0 : vector<16x32xf32> to vector<16x32xbf16>
    %c0_1 = arith.constant 0 : index
    %c0_2 = arith.constant 0 : index
    %2 = vector.load %arg2[%c0_1, %c0_2] : memref<32x128xbf16, #tpu.memory_space<vmem>>, vector<32x128xbf16>
    %cst = arith.constant dense<0.000000e+00> : vector<16x128xf32>
    %3 = tpu.matmul %1, %2, %cst {dimension_numbers = #tpu.dot_dimension_numbers<[1], [0], [0], [1], [0, 0, 1, 1], [], []>} : vector<16x32xbf16>, vector<32x128xbf16>, vector<16x128xf32> -> vector<16x128xf32>
    %c0_3 = arith.constant 0 : index
    %c0_4 = arith.constant 0 : index
    %4 = vector.load %arg3[%c0_3, %c0_4] : memref<1x128xf32, #tpu.memory_space<vmem>>, vector<1x128xf32>
    %5 = vector.broadcast %4 : vector<1x128xf32> to vector<16x128xf32>
    %6 = arith.addf %3, %5 : vector<16x128xf32>
    %cst_5 = arith.constant dense<0xFF800000> : vector<16xf32>
    %7 = vector.multi_reduction <maximumf>, %6, %cst_5 [1] : vector<16x128xf32> to vector<16xf32>
    %8 = vector.shape_cast %7 : vector<16xf32> to vector<16x1xf32>
    %9 = vector.broadcast %8 : vector<16x1xf32> to vector<16x128xf32>
    %10 = arith.subf %6, %9 : vector<16x128xf32>
    %11 = math.exp %10 : vector<16x128xf32>
    %cst_6 = arith.constant dense<0.000000e+00> : vector<16xf32>
    %12 = vector.multi_reduction <add>, %11, %cst_6 [1] : vector<16x128xf32> to vector<16xf32>
    %13 = vector.shape_cast %12 : vector<16xf32> to vector<16x1xf32>
    %14 = tpu.reciprocal %13 {approx = true} : vector<16x1xf32> -> vector<16x1xf32>
    %15 = vector.broadcast %14 : vector<16x1xf32> to vector<16x128xf32>
    %16 = arith.mulf %11, %15 : vector<16x128xf32>
    %17 = arith.truncf %16 : vector<16x128xf32> to vector<16x128xbf16>
    %c0_7 = arith.constant 0 : index
    %c0_8 = arith.constant 0 : index
    %18 = vector.load %arg4[%c0_7, %c0_8] : memref<16x128xbf16, #tpu.memory_space<vmem>>, vector<16x128xbf16>
    tpu.vector_store %arg4[%c0_7, %c0_8], %17 {strides = array<i32>} : memref<16x128xbf16, #tpu.memory_space<vmem>>, vector<16x128xbf16>,
    return
  }
  func.func @transform_0(%arg0: i32) -> (i32, i32) {
    %c0_i32 = arith.constant 0 : i32
    %c0_i32_0 = arith.constant 0 : i32
    return %arg0, %c0_i32 : i32, i32
  }
  func.func @transform_1(%arg0: i32) -> (i32, i32) {
    %c0_i32 = arith.constant 0 : i32
    %c0_i32_0 = arith.constant 0 : i32
    %c0_i32_1 = arith.constant 0 : i32
    return %c0_i32, %c0_i32_0 : i32, i32
  }
  func.func @transform_2(%arg0: i32) -> (i32, i32) {
    %c0_i32 = arith.constant 0 : i32
    %c0_i32_0 = arith.constant 0 : i32
    %c0_i32_1 = arith.constant 0 : i32
    return %c0_i32, %c0_i32_0 : i32, i32
  }
  func.func @transform_3(%arg0: i32) -> (i32, i32) {
    %c0_i32 = arith.constant 0 : i32
    %c0_i32_0 = arith.constant 0 : i32
    return %arg0, %c0_i32 : i32, i32
  }
}

</mosaic_0001>

<bundles_post_ra>
// kernel: tpu_custom_call.1
= control target key start
LH: loop header
LB: loop body
LE: loop exit
PB: predicated region body
PF: predicated region fallthrough
CT: control target
= control target key end

     0   :  { %8 = vsyncpa [#allocation3], 0  ;;  %s350_s0 = inlined_call_operand.hbm [shape: f32[16,32], index: 0, kind: input, shape index: {}]   ;;  %s351_s1 = inlined_call_operand.hbm [shape: bf16[32,128], index: 1, kind: input, shape index: {}]   ;;  %s352_s2 = inlined_call_operand.vmem [shape: f32[1,128], index: 2, kind: input, shape index: {}]   ;;  %s353_s3 = inlined_call_operand.hbm [shape: bf16[16,128], index: 3, kind: output, shape index: {}]  }
   0x1   :  { %9 = vsyncpa [#allocation6], 0 }
   0x2   :  { %10 = vsyncpa [#allocation4], 0  ;;  %s276_s12 = smov [#allocation2]   ;;  %s204_s16 = scalar_lea.hbm %s350_s0, 256 }
   0x3   :  { %s16_s13 = sshll.u32 %s276_s12, 4  ;;  %p205_p0 = scmp.ne.s32.totalorder %s350_s0, %s204_s16  ;;  %s17_s13 = int_to_ptr.vmem [resolvable:$true] %s16_s13 }
   0x4   :  { %p208_p1 = scmp.lt.u32.totalorder %s204_s16, %s350_s0 }
   0x6   :  { %p210_p2 = pnand %p208_p1, %p205_p0 }
   0x8   :  { %213 = shalt.err (!%p210_p2)
}
   0x9   :  { %s214_s21 = scalar_lea.vmem %s17_s13, 256  ;;  %p219_p4 = scmp.lt.s32.totalorder %s17_s13, %s17_s13 }
   0xa   :  { %p215_p3 = scmp.ne.s32.totalorder %s17_s13, %s214_s21  ;;  %p220_p5 = scmp.lt.s32.totalorder %s214_s21, %s214_s21 }
   0xc   :  { %p221_p6 = por %p220_p5, %p219_p4 }
   0xe   :  { %p222_p7 = pnand %p221_p6, %p215_p3 }
  0x10   :  { %225 = shalt.err (!%p222_p7)
}
  0x11   :  { %s277_s22 = smov 128   ;;  %s278_s23 = smov 8  }
  0x12   :  { %22 = dma.hbm_to_vmem [thread:$0]  %s350_s0, 256, %s17_s13, [#allocation3], %s277_s22, %s277_s22, %s278_s23  }
  0x13   :  { %s279_s26 = smov [#allocation5]   ;;  %s226_s30 = scalar_lea.hbm %s351_s1, 256 }
  0x14   :  { %s28_s27 = sshll.u32 %s279_s26, 4  ;;  %p227_p8 = scmp.ne.s32.totalorder %s351_s1, %s226_s30  ;;  %s29_s27 = int_to_ptr.vmem [resolvable:$true] %s28_s27 }
  0x15   :  { %p230_p9 = scmp.lt.u32.totalorder %s226_s30, %s351_s1 }
  0x17   :  { %p232_p10 = pnand %p230_p9, %p227_p8 }
  0x19   :  { %235 = shalt.err (!%p232_p10)
}
  0x1a   :  { %s236_s8 = scalar_lea.vmem %s29_s27, 256  ;;  %p241_p12 = scmp.lt.s32.totalorder %s29_s27, %s29_s27 }
  0x1b   :  { %p237_p11 = scmp.ne.s32.totalorder %s29_s27, %s236_s8  ;;  %p242_p13 = scmp.lt.s32.totalorder %s236_s8, %s236_s8 }
  0x1d   :  { %p243_p0 = por %p242_p13, %p241_p12 }
  0x1f   :  { %p244_p1 = pnand %p243_p0, %p237_p11 }
  0x21   :  { %247 = shalt.err (!%p244_p1)
}
  0x22   :  { %s280_s0 = smov 64   ;;  %s281_s9 = smov 4  }
  0x23   :  { %34 = dma.hbm_to_vmem [thread:$0]  %s351_s1, 256, %s29_s27, [#allocation6], %s280_s0, %s280_s0, %s281_s9  }
  0x24   :  { %270 = dma.done.wait [#allocation3], 256  }
  0x25   :  { %271 = vsyncadd [#allocation3], 4294967040 }
  0x26   :  { %272 = dma.done.wait [#allocation6], 256  }
  0x27   :  { %273 = vsyncadd [#allocation6], 4294967040  ;;  %v282_v0 = vmov 0.0   ;;  %vm283_vm0 = vmmov 0   ;;  %v194_v1 = vld [vmem:[#allocation5] sm:$0xff]   ;;  %v195_v2 = vld [vmem:[#allocation5 + $0x8] sm:$0xff]  }
  0x28   :  { %177 = vmatprep.subr.bf16.mxu0 %v282_v0  ;;  %181 = vmatprep.mubr.msk.bf16.mxu0 %vm283_vm0, %v282_v0  ;;  %v44_v3 = vld [vmem:[#allocation2] sm:$0xff]  ;;  %v45_v4 = vld [vmem:[#allocation2 + $0x8] sm:$0xff]  ;;  %vm70_vm1 = vcmask 261120  }
  0x29   :  { %178 = vmatpush3.bf16.msra.mxu0 %v194_v1  ;;  %v46_v5 = vpack.c.bf16 %v45_v4, %v44_v3  ;;  %v161_v6 = vld [vmem:[%s352_s2] ss:$0 sm:$0xff]  ;;  %s284_s2 = smov [#allocation7]  }
  0x2a   :  { %179 = vmatprep.subr.bf16.mxu0 %v282_v0  ;;  %s148_s13 = sshll.u32 %s284_s2, 4  ;;  %s149_s13 = int_to_ptr.vmem [resolvable:$true] %s148_s13 }
  0x2b   :  { %s248_s14 = scalar_lea.vmem %s149_s13, 128  ;;  %p253_p3 = scmp.lt.s32.totalorder %s149_s13, %s149_s13 }
  0x2c   :  { %p249_p2 = scmp.ne.s32.totalorder %s149_s13, %s248_s14  ;;  %p254_p4 = scmp.lt.s32.totalorder %s248_s14, %s248_s14 }
  0x2d   :  { %180 = vmatpush3.bf16.msra.mxu0 %v195_v2 }
  0x2e   :  { %p255_p5 = por %p254_p4, %p253_p3 }
  0x30   :  { %182 = vmatmul.mubr.msk.bf16.vlgmr.msra.gmra.mrb[0].mxu0 %vm70_vm1, %v46_v5  ;;  %p256_p6 = pnand %p255_p5, %p249_p2 }
 0x103   :  { %v108_v7 = vpop.f32.mrb[0].mxu0 }
 0x104   :  { %v109_v8 = vadd.f32 %v161_v6, %v108_v7  ;;  %v183_v9 = vpop.f32.mrb[1].mxu0 }
 0x105   :  { %v111_v10 = vpop.f32.mrb[2].mxu0 }
 0x106   :  { %115 = vmax.xlane.f32.xlu0 %v109_v8  ;;  %v184_v11 = vpop.f32.mrb[3].mxu0  ;;  %v112_v12 = vadd.f32 %v161_v6, %v111_v10 }
 0x10a   :  { %117 = vmax.xlane.f32.xlu0 %v112_v12 }
 0x193   :  { %v116_v13 = vpop.xlane.xlu0 %115 }
 0x194   :  { %v119_v14 = vsub.f32 %v109_v8, %v116_v13 }
 0x196   :  { %v121_v15 = vmul.f32 1.442695, %v119_v14 }
 0x197   :  { %v118_v16 = vpop.xlane.xlu0 %117 }
 0x198   :  { %196 = vpow2.f32 %v121_v15  ;;  %v120_v17 = vsub.f32 %v112_v12, %v118_v16 }
 0x19a   :  { %v123_v18 = vmul.f32 1.442695, %v120_v17 }
 0x19c   :  { %198 = vpow2.f32 %v123_v18 }
 0x1a2   :  { %v197_v19 = vpop.eup %196 }
 0x1a3   :  { %125 = vadd.xlane.f32.xlu1 %v197_v19 }
 0x1a6   :  { %v199_v20 = vpop.eup %198 }
 0x1a7   :  { %127 = vadd.xlane.f32.xlu1 %v199_v20 }
 0x230   :  { %v126_v21 = vpop.xlane.xlu1 %125 }
 0x231   :  { %200 = vrcp.f32 %v126_v21 }
 0x234   :  { %v128_v22 = vpop.xlane.xlu1 %127 }
 0x235   :  { %202 = vrcp.f32 %v128_v22 }
 0x23b   :  { %v201_v23 = vpop.eup %200 }
 0x23c   :  { %v131_v25 = vmul.f32 %v201_v23, %v197_v19 }
 0x23f   :  { %v203_v24 = vpop.eup %202 }
 0x240   :  { %v132_v26 = vmul.f32 %v203_v24, %v199_v20 }
 0x242   :  { %v172_v27 = vpack.c.bf16 %v132_v26, %v131_v25 }
 0x244   :  { %173 = vst [vmem:[#allocation7] sm:$0xff] %v172_v27  }
 0x245   :  { %259 = shalt.err (!%p256_p6)
}
 0x246   :  { %s260_s17 = scalar_lea.hbm %s353_s3, 128 }
 0x247   :  { %p261_p7 = scmp.ne.s32.totalorder %s353_s3, %s260_s17  ;;  %p264_p8 = scmp.lt.u32.totalorder %s260_s17, %s353_s3 }
 0x249   :  { %p266_p9 = pnand %p264_p8, %p261_p7 }
 0x24b   :  { %269 = shalt.err (!%p266_p9)
}
 0x24c   :  { %154 = dma.vmem_to_hbm [thread:$0]  %s149_s13, 128, %s353_s3, [#allocation4], %s280_s0, %s280_s0, %s281_s9  }
 0x24d   :  { %274 = dma.done.wait [#allocation4], 128  }
 0x24e   :  { %275 = vsyncadd [#allocation4], 4294967168 }
 0x24f   :  { %158 = vsyncpa [#allocation3], 1 }
 0x250   :  { %159 = vsyncpa [#allocation6], 1 }
 0x251   :  { %160 = vsyncpa [#allocation4], 1 }

</bundles_post_ra>
